<compile_context>
chip_gen: v6e
topology: v6e:2x2x1
jax: 0.10.0
libtpu: 0.0.40
codegen_flags: <defaults>
</compile_context>

<pallas_src>
import functools

import jax
import jax.numpy as jnp
from jax.experimental import pallas as pl
from jax.experimental.pallas import tpu as pltpu

BN_EPS = 1e-5


def _round_up(a, b):
    return (a + b - 1) // b * b


def _mlp_kernel(x_ref, w0_ref, b0_ref, w1_ref, b1_ref, w2_ref, b2_ref, o_ref):
    # Matmul dtype follows the weight dtype (f32 or bf16); accumulation is f32,
    # bias add / ReLU stay f32 (v5e has no bf16 VPU).
    mm = w0_ref.dtype

    # ---- layer_0 (BatchNorm folded in) + ReLU (dropout == identity, eval) ----
    h = jnp.dot(x_ref[...].astype(mm), w0_ref[...],
                preferred_element_type=jnp.float32) + b0_ref[...]
    h = jnp.maximum(h, 0.0)

    # ---- layer_1 + ReLU ----
    h = jnp.dot(h.astype(mm), w1_ref[...],
                preferred_element_type=jnp.float32) + b1_ref[...]
    h = jnp.maximum(h, 0.0)

    # ---- layer_2 ----
    out = jnp.dot(h.astype(mm), w2_ref[...],
                  preferred_element_type=jnp.float32) + b2_ref[...]
    o_ref[...] = out.astype(o_ref.dtype)


@functools.partial(jax.jit, static_argnames=("tile_n", "matmul_dtype"))
def mlp_forward(x, params, *, tile_n=256, matmul_dtype=jnp.float32):
    """x: (N, D) float32.  params: dict of BN + 3 linear layers."""
    N, D = x.shape
    H0 = params["w0"].shape[1]
    H1 = params["w1"].shape[1]
    OUT = params["w2"].shape[1]
    OUT_pad = _round_up(OUT, 128)          # lane-dense output stores

    # Batch tile: large enough to fill the MXU, but keep >= 2 grid steps so the
    # "parallel" axis can shard across v7x's two TensorCores.
    tile = min(tile_n, _round_up(max((N + 1) // 2, 8), 8))
    N_pad = _round_up(N, tile)

    # ---- fold BatchNorm1d (eval) into layer_0 (one-time, tiny) ----
    scale = params["bn_gamma"] * jax.lax.rsqrt(params["bn_var"] + BN_EPS)
    shift = params["bn_beta"] - params["bn_mean"] * scale
    w0 = params["w0"]
    w0f = (scale[:, None] * w0).astype(matmul_dtype)
    b0f = (params["b0"] + shift @ w0).reshape(1, H0).astype(jnp.float32)

    w1 = params["w1"].astype(matmul_dtype)
    b1 = params["b1"].reshape(1, H1).astype(jnp.float32)

    # Pad the output projection to a multiple of 128 lanes.
    w2 = jnp.zeros((H1, OUT_pad), matmul_dtype).at[:, :OUT].set(
        params["w2"].astype(matmul_dtype))
    b2 = jnp.zeros((1, OUT_pad), jnp.float32).at[:, :OUT].set(params["b2"])

    # Pad ragged batches with zero rows; sliced off below.
    xp = x if N_pad == N else jnp.pad(x, ((0, N_pad - N), (0, 0)))

    full = lambda shape: pl.BlockSpec(shape, lambda i: (0, 0))

    out = pl.pallas_call(
        _mlp_kernel,
        out_shape=jax.ShapeDtypeStruct((N_pad, OUT_pad), x.dtype),
        grid_spec=pltpu.PrefetchScalarGridSpec(
            num_scalar_prefetch=0,
            grid=(N_pad // tile,),
            in_specs=[
                pl.BlockSpec((tile, D), lambda i: (i, 0)),   # x tile
                full((D, H0)), full((1, H0)),                # layer_0 (BN folded)
                full((H0, H1)), full((1, H1)),               # layer_1
                full((H1, OUT_pad)), full((1, OUT_pad)),     # layer_2 (padded)
            ],
            out_specs=pl.BlockSpec((tile, OUT_pad), lambda i: (i, 0)),
        ),
        compiler_params=pltpu.CompilerParams(
            dimension_semantics=("parallel",)),
    )(xp, w0f, b0f, w1, b1, w2, b2)

    return out[:N, :OUT]


def _xavier_uniform(key, fan_in, fan_out, dtype=jnp.float32):
    # matches torch.nn.init.xavier_uniform_ on a (fan_out, fan_in) weight;
    # stored transposed as (fan_in, fan_out).
    limit = (6.0 / (fan_in + fan_out)) ** 0.5
    return jax.random.uniform(key, (fan_in, fan_out), dtype, -limit, limit)


def init_params(key, dim_in, dim_out):
    H0, H1 = 256, 128
    k0, k1, k2, kb0, kb1, kb2, kg, kb, km, kv = jax.random.split(key, 10)
    u = lambda k, n, fan_in: jax.random.uniform(
        k, (n,), jnp.float32, -1.0 / fan_in ** 0.5, 1.0 / fan_in ** 0.5)
    return {
        # Non-trivial BN stats so the BN-folding path is actually exercised.
        "bn_gamma": jax.random.uniform(kg, (dim_in,), jnp.float32, 0.5, 1.5),
        "bn_beta": 0.1 * jax.random.normal(kb, (dim_in,), jnp.float32),
        "bn_mean": jax.random.normal(km, (dim_in,), jnp.float32),
        "bn_var": jax.random.uniform(kv, (dim_in,), jnp.float32, 0.5, 1.5),
        "w0": _xavier_uniform(k0, dim_in, H0),
        "b0": u(kb0, H0, dim_in),
        "w1": _xavier_uniform(k1, H0, H1),
        "b1": u(kb1, H1, H0),
        "w2": _xavier_uniform(k2, H1, dim_out),
        "b2": u(kb2, dim_out, H1),
    }


def _reference(x, p):
    h = (x - p["bn_mean"]) / jnp.sqrt(p["bn_var"] + BN_EPS) * p["bn_gamma"] + p["bn_beta"]
    h = jnp.maximum(h @ p["w0"] + p["b0"], 0.0)
    h = jnp.maximum(h @ p["w1"] + p["b1"], 0.0)
    return h @ p["w2"] + p["b2"]


if __name__ == "__main__":
    key = jax.random.PRNGKey(0)
    k_x, k_p = jax.random.split(key)

    N, D_IN, D_OUT = 16, 128, 32   # small synthetic shapes (var_x/y last dims)
    x = jax.random.normal(k_x, (N, D_IN), jnp.float32)
    params = init_params(k_p, D_IN, D_OUT)
    ref = _reference(x, params)

    # f32 path
    out = jax.block_until_ready(mlp_forward(x, params))
    assert out.shape == (N, D_OUT)
    assert jnp.allclose(out, ref, atol=1e-4, rtol=1e-4), "f32 mismatch vs reference"

    # ragged batch (exercises the padding path, N not a multiple of the tile)
    out_ragged = jax.block_until_ready(mlp_forward(x[:10], params))
    assert out_ragged.shape == (10, D_OUT)
    assert jnp.allclose(out_ragged, ref[:10], atol=1e-4, rtol=1e-4), "ragged mismatch"

    # bf16 matmul path (v6e/v7x fast path): f32 accumulation, looser tolerance
    out_bf16 = jax.block_until_ready(
        mlp_forward(x, params, matmul_dtype=jnp.bfloat16))
    assert jnp.allclose(out_bf16, ref, atol=5e-2, rtol=5e-2), "bf16 mismatch"

    print("KERNEL_OK")
</pallas_src>

<mosaic_0001>
module attributes {stable_mosaic.version = 11 : i64} {
  func.func @_mlp_kernel(%arg0: i32, %arg1: memref<8x128xf32, #tpu.memory_space<vmem>>, %arg2: memref<128x256xf32, #tpu.memory_space<vmem>>, %arg3: memref<1x256xf32, #tpu.memory_space<vmem>>, %arg4: memref<256x128xf32, #tpu.memory_space<vmem>>, %arg5: memref<1x128xf32, #tpu.memory_space<vmem>>, %arg6: memref<128x128xf32, #tpu.memory_space<vmem>>, %arg7: memref<1x128xf32, #tpu.memory_space<vmem>>, %arg8: memref<8x128xf32, #tpu.memory_space<vmem>>) attributes {dimension_semantics = [#tpu.dimension_semantics<parallel>], iteration_bounds = array<i64: 2>, scalar_prefetch = 0 : i64, scratch_operands = 0 : i64, tpu.core_type = #tpu.core_type<tc>, window_params = [{transform_indices = @transform_0, window_bounds = array<i64: 8, 128>}, {pipeline_mode = #tpu.pipeline_mode<synchronous>, transform_indices = @transform_1, window_bounds = array<i64: 128, 256>}, {pipeline_mode = #tpu.pipeline_mode<synchronous>, transform_indices = @transform_2, window_bounds = array<i64: 1, 256>}, {pipeline_mode = #tpu.pipeline_mode<synchronous>, transform_indices = @transform_3, window_bounds = array<i64: 256, 128>}, {pipeline_mode = #tpu.pipeline_mode<synchronous>, transform_indices = @transform_4, window_bounds = array<i64: 1, 128>}, {pipeline_mode = #tpu.pipeline_mode<synchronous>, transform_indices = @transform_5, window_bounds = array<i64: 128, 128>}, {pipeline_mode = #tpu.pipeline_mode<synchronous>, transform_indices = @transform_6, window_bounds = array<i64: 1, 128>}, {transform_indices = @transform_7, window_bounds = array<i64: 8, 128>}]} {
    %c0 = arith.constant 0 : index
    %c0_0 = arith.constant 0 : index
    %0 = vector.load %arg1[%c0, %c0_0] : memref<8x128xf32, #tpu.memory_space<vmem>>, vector<8x128xf32>
    %c0_1 = arith.constant 0 : index
    %c0_2 = arith.constant 0 : index
    %1 = vector.load %arg2[%c0_1, %c0_2] : memref<128x256xf32, #tpu.memory_space<vmem>>, vector<128x256xf32>
    %cst = arith.constant dense<0.000000e+00> : vector<8x256xf32>
    %2 = tpu.matmul %0, %1, %cst {dimension_numbers = #tpu.dot_dimension_numbers<[1], [0], [0], [1], [0, 0, 1, 1], [], []>} : vector<8x128xf32>, vector<128x256xf32>, vector<8x256xf32> -> vector<8x256xf32>
    %c0_3 = arith.constant 0 : index
    %c0_4 = arith.constant 0 : index
    %3 = vector.load %arg3[%c0_3, %c0_4] : memref<1x256xf32, #tpu.memory_space<vmem>>, vector<1x256xf32>
    %4 = vector.broadcast %3 : vector<1x256xf32> to vector<8x256xf32>
    %5 = arith.addf %2, %4 : vector<8x256xf32>
    %cst_5 = arith.constant 0.000000e+00 : f32
    %6 = vector.broadcast %cst_5 : f32 to vector<8x256xf32>
    %7 = arith.maximumf %5, %6 : vector<8x256xf32>
    %c0_6 = arith.constant 0 : index
    %c0_7 = arith.constant 0 : index
    %8 = vector.load %arg4[%c0_6, %c0_7] : memref<256x128xf32, #tpu.memory_space<vmem>>, vector<256x128xf32>
    %cst_8 = arith.constant dense<0.000000e+00> : vector<8x128xf32>
    %9 = tpu.matmul %7, %8, %cst_8 {dimension_numbers = #tpu.dot_dimension_numbers<[1], [0], [0], [1], [0, 0, 1, 1], [], []>} : vector<8x256xf32>, vector<256x128xf32>, vector<8x128xf32> -> vector<8x128xf32>
    %c0_9 = arith.constant 0 : index
    %c0_10 = arith.constant 0 : index
    %10 = vector.load %arg5[%c0_9, %c0_10] : memref<1x128xf32, #tpu.memory_space<vmem>>, vector<1x128xf32>
    %11 = vector.broadcast %10 : vector<1x128xf32> to vector<8x128xf32>
    %12 = arith.addf %9, %11 : vector<8x128xf32>
    %cst_11 = arith.constant 0.000000e+00 : f32
    %13 = vector.broadcast %cst_11 : f32 to vector<8x128xf32>
    %14 = arith.maximumf %12, %13 : vector<8x128xf32>
    %c0_12 = arith.constant 0 : index
    %c0_13 = arith.constant 0 : index
    %15 = vector.load %arg6[%c0_12, %c0_13] : memref<128x128xf32, #tpu.memory_space<vmem>>, vector<128x128xf32>
    %cst_14 = arith.constant dense<0.000000e+00> : vector<8x128xf32>
    %16 = tpu.matmul %14, %15, %cst_14 {dimension_numbers = #tpu.dot_dimension_numbers<[1], [0], [0], [1], [0, 0, 1, 1], [], []>} : vector<8x128xf32>, vector<128x128xf32>, vector<8x128xf32> -> vector<8x128xf32>
    %c0_15 = arith.constant 0 : index
    %c0_16 = arith.constant 0 : index
    %17 = vector.load %arg7[%c0_15, %c0_16] : memref<1x128xf32, #tpu.memory_space<vmem>>, vector<1x128xf32>
    %18 = vector.broadcast %17 : vector<1x128xf32> to vector<8x128xf32>
    %19 = arith.addf %16, %18 : vector<8x128xf32>
    %c0_17 = arith.constant 0 : index
    %c0_18 = arith.constant 0 : index
    %20 = vector.load %arg8[%c0_17, %c0_18] : memref<8x128xf32, #tpu.memory_space<vmem>>, vector<8x128xf32>
    tpu.vector_store %arg8[%c0_17, %c0_18], %19 {strides = array<i32>} : memref<8x128xf32, #tpu.memory_space<vmem>>, vector<8x128xf32>,
    return
  }
  func.func @transform_0(%arg0: i32) -> (i32, i32) {
    %c0_i32 = arith.constant 0 : i32
    %c0_i32_0 = arith.constant 0 : i32
    return %arg0, %c0_i32 : i32, i32
  }
  func.func @transform_1(%arg0: i32) -> (i32, i32) {
    %c0_i32 = arith.constant 0 : i32
    %c0_i32_0 = arith.constant 0 : i32
    %c0_i32_1 = arith.constant 0 : i32
    return %c0_i32, %c0_i32_0 : i32, i32
  }
  func.func @transform_2(%arg0: i32) -> (i32, i32) {
    %c0_i32 = arith.constant 0 : i32
    %c0_i32_0 = arith.constant 0 : i32
    %c0_i32_1 = arith.constant 0 : i32
    return %c0_i32, %c0_i32_0 : i32, i32
  }
  func.func @transform_3(%arg0: i32) -> (i32, i32) {
    %c0_i32 = arith.constant 0 : i32
    %c0_i32_0 = arith.constant 0 : i32
    %c0_i32_1 = arith.constant 0 : i32
    return %c0_i32, %c0_i32_0 : i32, i32
  }
  func.func @transform_4(%arg0: i32) -> (i32, i32) {
    %c0_i32 = arith.constant 0 : i32
    %c0_i32_0 = arith.constant 0 : i32
    %c0_i32_1 = arith.constant 0 : i32
    return %c0_i32, %c0_i32_0 : i32, i32
  }
  func.func @transform_5(%arg0: i32) -> (i32, i32) {
    %c0_i32 = arith.constant 0 : i32
    %c0_i32_0 = arith.constant 0 : i32
    %c0_i32_1 = arith.constant 0 : i32
    return %c0_i32, %c0_i32_0 : i32, i32
  }
  func.func @transform_6(%arg0: i32) -> (i32, i32) {
    %c0_i32 = arith.constant 0 : i32
    %c0_i32_0 = arith.constant 0 : i32
    %c0_i32_1 = arith.constant 0 : i32
    return %c0_i32, %c0_i32_0 : i32, i32
  }
  func.func @transform_7(%arg0: i32) -> (i32, i32) {
    %c0_i32 = arith.constant 0 : i32
    %c0_i32_0 = arith.constant 0 : i32
    return %arg0, %c0_i32 : i32, i32
  }
}

</mosaic_0001>

<bundles_post_ra>
// kernel: mlp_forward.1
= control target key start
LH: loop header
LB: loop body
LE: loop exit
PB: predicated region body
PF: predicated region fallthrough
CT: control target
= control target key end

     0   :  { %12 = vsyncpa [#allocation3], 0  ;;  %s1279_s0 = inlined_call_operand.vmem [shape: f32[16,128], index: 0, kind: input, shape index: {}]   ;;  %s1280_s1 = inlined_call_operand.vmem [shape: f32[128,256], index: 1, kind: input, shape index: {}]   ;;  %s1281_s2 = inlined_call_operand.vmem [shape: f32[1,256], index: 2, kind: input, shape index: {}]   ;;  %s1282_s3 = inlined_call_operand.vmem [shape: f32[256,128], index: 3, kind: input, shape index: {}]   ;;  %s1283_s4 = inlined_call_operand.vmem [shape: f32[1,128], index: 4, kind: input, shape index: {}]   ;;  %s1284_s5 = inlined_call_operand.vmem [shape: f32[128,128], index: 5, kind: input, shape index: {}]   ;;  %s1285_s6 = inlined_call_operand.vmem [shape: f32[1,128], index: 6, kind: input, shape index: {}]   ;;  %s1286_s7 = inlined_call_operand.hbm [shape: f32[16,128], index: 7, kind: output, shape index: {}]  }
   0x1   :  { %14 = vsyncpa [#allocation3 + $0x1], 0  ;;  %s914_s24 = smov 0   ;;  %s916_s25 = smov 0  }
   0x2   :  { %s918_s26 = smov 0   ;;  %s920_s27 = smov 0  }
   0x3 LB: > { %s935_s28 = sadd.s32 4294967295, %s869_s27   ;;  %s669_s29 = sadd.s32 4294967294, %s869_s27   ;;  %s869_s27 = sphi %s920_s27, %s1292_s27   ;;  %s865_s26 = sphi %s918_s26, %s1291_s26   ;;  %s861_s25 = sphi %s916_s25, %s1290_s25   ;;  %s857_s24 = sphi %s914_s24, %s1289_s24  }
   0x4   : > { %s939_s30 = sadd.s32 1, %s869_s27   ;;  %s179_s8 = sadd.s32 1, %s865_s26 }
   0x5   : > { %s176_s9 = ssub.s32 %s869_s27, %s939_s30  ;;  %p189_p0 = scmp.ne.s32.totalorder %s865_s26, %s861_s25 }
   0x6   : > { %p177_p1 = scmp.eq.s32.totalorder %s176_s9, 0  ;;  %p190_p2 = scmp.eq.s32.totalorder %s935_s28, 1 }
   0x7   : > { %p195_p3 = scmp.ne.s32.totalorder %s861_s25, %s857_s24  ;;  %p196_p4 = scmp.eq.s32.totalorder %s669_s29, 1 }
   0x8   : > { %s950_s10 = scalar_select %p177_p1, %s865_s26, %s179_s8  }
   0x9   : > { %p952_p5 = por %p190_p2, %p189_p0  ;;  %p956_p6 = por %p196_p4, %p195_p3 }
   0xa   : > { %p672_p7 = scmp.ge.s32.totalorder %s869_s27, 1  ;;  %p239_p8 = scmp.lt.s32.totalorder %s869_s27, 3 }
   0xc   : > { %p240_p9 = pnand %p672_p7, %p239_p8 }
   0xd   : > { %p270_p10 = scmp.lt.s32.totalorder (!%p240_p9), %s935_s28, 1  ;;  %s267_s16 = sand.u32 (!%p240_p9), 1, %s861_s25  }
   0xe   : > { %243 = sbr.rel (%p240_p9) target bundleno = 661 (0x295), region = 48  ;;  %s673_s18 = sshll.u32 (!%p240_p9), %s267_s16, 3 }
   0xf   : > { %s269_s21 = scalar_lea.vmem (!%p240_p9), [#allocation2], %s673_s18  ;;  %s873_s13 = smov (!%p240_p9), [#allocation2]  }
  0x10   : > { %s610_s22 = sshll.u32 (!%p240_p9), %s269_s21, 4  ;;  %s611_s22 = int_to_ptr.vmem [resolvable:$true] %s610_s22 }
  0x11   : > { %s809_s9 = scalar_lea.vmem (!%p240_p9), %s611_s22, 128 }
  0x12   : > { %p810_p11 = scmp.ne.s32.totalorder (!%p240_p9), %s611_s22, %s809_s9 }
  0x13   : > { %v306_v0 = vld [vmem:[%s1280_s1 + $0xf8] sm:$0xff]  ;;  %v305_v1 = vld [vmem:[%s1280_s1 + $0xf0] sm:$0xff]  ;;  %v304_v2 = vld [vmem:[%s1280_s1 + $0xe8] sm:$0xff]  ;;  %v871_v4 = vmov 0.0   ;;  %s1069_s8 = scalar_select %p270_p10, %s935_s28, 1  ;;  %vm872_vm0 = vmmov 0  }
  0x14   : > { %319 = vmatprep.subr.mxu0 %v306_v0  ;;  %v303_v3 = vld [vmem:[%s1280_s1 + $0xe0] sm:$0xff]  ;;  %383 = vmatprep.mubr.f32.mxu0 %v871_v4  ;;  %v302_v5 = vld [vmem:[%s1280_s1 + $0xd8] sm:$0xff]  ;;  %v301_v6 = vld [vmem:[%s1280_s1 + $0xd0] sm:$0xff]  ;;  %p811_p12 = pnand %p810_p11, %p952_p5 }
  0x15   : > { %320 = vmatpush1.msra.mxu0 %v305_v1  ;;  %v300_v7 = vld [vmem:[%s1280_s1 + $0xc8] sm:$0xff]  ;;  %v299_v8 = vld [vmem:[%s1280_s1 + $0xc0] sm:$0xff]  ;;  %v298_v9 = vld [vmem:[%s1280_s1 + $0xb8] sm:$0xff]  ;;  %s674_s15 = sshll.u32 %s1069_s8, 3 }
  0x16   : > { %321 = vmatprep.subr.mxu0 %v304_v2  ;;  %v297_v10 = vld [vmem:[%s1280_s1 + $0xb0] sm:$0xff]  ;;  %v296_v11 = vld [vmem:[%s1280_s1 + $0xa8] sm:$0xff]  ;;  %v295_v12 = vld [vmem:[%s1280_s1 + $0xa0] sm:$0xff]  ;;  %s273_s17 = scalar_lea.vmem %s1279_s0, %s674_s15  ;;  %s597_s15 = scalar_lea.sflag [#allocation3], %s267_s16 }
  0x17   : > { %322 = vmatpush1.msra.mxu0 %v303_v3  ;;  %v294_v13 = vld [vmem:[%s1280_s1 + $0x98] sm:$0xff]  ;;  %v293_v14 = vld [vmem:[%s1280_s1 + $0x90] sm:$0xff]  ;;  %v292_v18 = vld [vmem:[%s1280_s1 + $0x88] sm:$0xff]  ;;  %p812_p13 = pneg %p811_p12 }
  0x18   : > { %323 = vmatprep.subr.mxu0 %v302_v5  ;;  %v423_v15 = vld [vmem:[%s1282_s3 + $0xf8] sm:$0xff]  ;;  %v422_v17 = vld [vmem:[%s1282_s3 + $0xf0] sm:$0xff]  ;;  %v291_v20 = vld [vmem:[%s1280_s1 + $0x80] sm:$0xff] }
  0x19   : > { %324 = vmatpush1.msra.mxu0 %v301_v6  ;;  %v407_v16 = vld [vmem:[%s1282_s3 + $0x78] sm:$0xff]  ;;  %681 = vmatprep.subr.mxu1 %v423_v15  ;;  %v406_v19 = vld [vmem:[%s1282_s3 + $0x70] sm:$0xff]  ;;  %v421_v21 = vld [vmem:[%s1282_s3 + $0xe8] sm:$0xff] }
  0x1a   : > { %325 = vmatprep.subr.mxu0 %v300_v7  ;;  %682 = vmatpush3.msra.mxu1 %v407_v16  ;;  %v290_v22 = vld [vmem:[%s1280_s1 + $0x78] sm:$0xff]  ;;  %v405_v23 = vld [vmem:[%s1282_s3 + $0x68] sm:$0xff]  ;;  %v289_v24 = vld [vmem:[%s1280_s1 + $0x70] sm:$0xff] }
  0x1b   : > { %326 = vmatpush1.msra.mxu0 %v299_v8  ;;  %683 = vmatprep.subr.mxu1 %v422_v17  ;;  %v420_v25 = vld [vmem:[%s1282_s3 + $0xe0] sm:$0xff]  ;;  %v288_v26 = vld [vmem:[%s1280_s1 + $0x68] sm:$0xff]  ;;  %v419_v29 = vld [vmem:[%s1282_s3 + $0xd8] sm:$0xff] }
  0x1c   : > { %327 = vmatprep.subr.mxu0 %v298_v9  ;;  %684 = vmatpush3.msra.mxu1 %v406_v19  ;;  %v404_v27 = vld [vmem:[%s1282_s3 + $0x60] sm:$0xff]  ;;  %v286_v30 = vld [vmem:[%s1280_s1 + $0x58] sm:$0xff]  ;;  %v285_v32 = vld [vmem:[%s1280_s1 + $0x50] sm:$0xff] }
  0x1d   : > { %328 = vmatpush1.msra.mxu0 %v297_v10  ;;  %685 = vmatprep.subr.mxu1 %v421_v21  ;;  %v287_v28 = vld [vmem:[%s1280_s1 + $0x60] sm:$0xff]  ;;  %v403_v31 = vld [vmem:[%s1282_s3 + $0x58] sm:$0xff]  ;;  %v418_v33 = vld [vmem:[%s1282_s3 + $0xd0] sm:$0xff] }
  0x1e   : > { %329 = vmatprep.subr.mxu0 %v296_v11  ;;  %686 = vmatpush3.msra.mxu1 %v405_v23  ;;  %v284_v34 = vld [vmem:[%s1280_s1 + $0x48] sm:$0xff]  ;;  %v402_v35 = vld [vmem:[%s1282_s3 + $0x50] sm:$0xff]  ;;  %v283_v36 = vld [vmem:[%s1280_s1 + $0x40] sm:$0xff] }
  0x1f   : > { %330 = vmatpush1.msra.mxu0 %v295_v12  ;;  %687 = vmatprep.subr.mxu1 %v420_v25  ;;  %v417_v37 = vld [vmem:[%s1282_s3 + $0xc8] sm:$0xff]  ;;  %v282_v38 = vld [vmem:[%s1280_s1 + $0x38] sm:$0xff]  ;;  %v281_v40 = vld [vmem:[%s1280_s1 + $0x30] sm:$0xff] }
  0x20   : > { %331 = vmatprep.subr.mxu0 %v294_v13  ;;  %688 = vmatpush3.msra.mxu1 %v404_v27  ;;  %v401_v39 = vld [vmem:[%s1282_s3 + $0x48] sm:$0xff]  ;;  %v416_v41 = vld [vmem:[%s1282_s3 + $0xc0] sm:$0xff]  ;;  %v415_v45 = vld [vmem:[%s1282_s3 + $0xb8] sm:$0xff] }
  0x21   : > { %332 = vmatpush1.msra.mxu0 %v293_v14  ;;  %689 = vmatprep.subr.mxu1 %v419_v29  ;;  %v280_v42 = vld [vmem:[%s1280_s1 + $0x28] sm:$0xff]  ;;  %v400_v43 = vld [vmem:[%s1282_s3 + $0x40] sm:$0xff]  ;;  %v278_v46 = vld [vmem:[%s1280_s1 + $0x18] sm:$0xff]  ;;  %v309_v14 = vlaneseq }
  0x22   : > { %333 = vmatprep.subr.mxu0 %v292_v18  ;;  %690 = vmatpush3.msra.mxu1 %v403_v31  ;;  %v279_v44 = vld [vmem:[%s1280_s1 + $0x20] sm:$0xff]  ;;  %v399_v47 = vld [vmem:[%s1282_s3 + $0x38] sm:$0xff]  ;;  %v277_v48 = vld [vmem:[%s1280_s1 + $0x10] sm:$0xff] }
  0x23   : > { %334 = vmatpush1.msra.mxu0 %v291_v20  ;;  %691 = vmatprep.subr.mxu1 %v418_v33  ;;  %v414_v49 = vld [vmem:[%s1282_s3 + $0xb0] sm:$0xff]  ;;  %v276_v50 = vld [vmem:[%s1280_s1 + $0x8] sm:$0xff]  ;;  %v275_v52 = vld [vmem:[%s1280_s1] sm:$0xff]  ;;  %v310_v15 = vshrl.u32 %v309_v14, 7 }
  0x24   : > { %335 = vmatprep.subr.mxu0 %v290_v22  ;;  %692 = vmatpush3.msra.mxu1 %v402_v35  ;;  %v398_v51 = vld [vmem:[%s1282_s3 + $0x30] sm:$0xff]  ;;  %v413_v53 = vld [vmem:[%s1282_s3 + $0xa8] sm:$0xff]  ;;  %v274_v54 = vld [vmem:[%s273_s17] sm:$0xff]  ;;  %s678_s17 = sshll.u32 %s935_s28, 7  ;;  %s813_s28 = sshll.u32 %s873_s13, 4  ;;  %s814_s28 = int_to_ptr.vmem [resolvable:$false] %s813_s28 }
  0x25   : > { %336 = vmatpush1.msra.mxu0 %v289_v24  ;;  %693 = vmatprep.subr.mxu1 %v417_v37  ;;  %v397_v55 = vld [vmem:[%s1282_s3 + $0x28] sm:$0xff]  ;;  %v412_v56 = vld [vmem:[%s1282_s3 + $0xa0] sm:$0xff]  ;;  %v411_v58 = vld [vmem:[%s1282_s3 + $0x98] sm:$0xff]  ;;  %v311_v16 = vsub.s32 0, %v310_v15  ;;  %v315_v18 = vsub.s32 1, %v310_v15  ;;  %s1244_s29 = scalar_lea.hbm %s1286_s7, %s678_s17  ;;  %s815_s14 = scalar_lea.vmem %s814_s28, 256 }
  0x26   : > { %337 = vmatprep.subr.mxu0 %v288_v26  ;;  %694 = vmatpush3.msra.mxu1 %v401_v39  ;;  %v396_v57 = vld [vmem:[%s1282_s3 + $0x20] sm:$0xff]  ;;  %v395_v59 = vld [vmem:[%s1282_s3 + $0x18] sm:$0xff]  ;;  %v410_v60 = vld [vmem:[%s1282_s3 + $0x90] sm:$0xff]  ;;  %p816_p0 = scmp.lt.s32.totalorder %s611_s22, %s814_s28  ;;  %p817_p1 = scmp.lt.s32.totalorder %s815_s14, %s809_s9 }
  0x27   : > { %338 = vmatpush1.msra.mxu0 %v287_v28  ;;  %695 = vmatprep.subr.mxu1 %v416_v41  ;;  %v394_v61 = vld [vmem:[%s1282_s3 + $0x10] sm:$0xff]  ;;  %v409_v62 = vld [vmem:[%s1282_s3 + $0x88] sm:$0xff]  ;;  %v408_v0 = vld [vmem:[%s1282_s3 + $0x80] sm:$0xff] }
  0x28   : > { %339 = vmatprep.subr.mxu0 %v286_v30  ;;  %696 = vmatpush3.msra.mxu1 %v400_v43  ;;  %v393_v63 = vld [vmem:[%s1282_s3 + $0x8] sm:$0xff]  ;;  %v392_v1 = vld [vmem:[%s1282_s3] sm:$0xff]  ;;  %v517_v2 = vld [vmem:[%s1284_s5 + $0x78] sm:$0xff]  ;;  %p818_p2 = por %p817_p1, %p816_p0 }
  0x29   : > { %340 = vmatpush1.msra.mxu0 %v285_v32  ;;  %697 = vmatprep.subr.mxu1 %v415_v45  ;;  %v516_v3 = vld [vmem:[%s1284_s5 + $0x70] sm:$0xff]  ;;  %v515_v5 = vld [vmem:[%s1284_s5 + $0x68] sm:$0xff]  ;;  %v514_v6 = vld [vmem:[%s1284_s5 + $0x60] sm:$0xff] }
  0x2a   : > { %341 = vmatprep.subr.mxu0 %v284_v34  ;;  %698 = vmatpush3.msra.mxu1 %v399_v47  ;;  %v513_v7 = vld [vmem:[%s1284_s5 + $0x58] sm:$0xff]  ;;  %v512_v8 = vld [vmem:[%s1284_s5 + $0x50] sm:$0xff]  ;;  %v511_v9 = vld [vmem:[%s1284_s5 + $0x48] sm:$0xff]  ;;  %p819_p3 = pnand %p818_p2, %p812_p13 }
  0x2b   : > { %342 = vmatpush1.msra.mxu0 %v283_v36  ;;  %699 = vmatprep.subr.mxu1 %v414_v49  ;;  %v510_v10 = vld [vmem:[%s1284_s5 + $0x40] sm:$0xff]  ;;  %v509_v11 = vld [vmem:[%s1284_s5 + $0x38] sm:$0xff]  ;;  %v508_v12 = vld [vmem:[%s1284_s5 + $0x30] sm:$0xff] }
  0x2c   : > { %343 = vmatprep.subr.mxu0 %v282_v38  ;;  %700 = vmatpush3.msra.mxu1 %v398_v51  ;;  %v507_v13 = vld [vmem:[%s1284_s5 + $0x28] sm:$0xff]  ;;  %v307_v17 = vld [vmem:[%s1281_s2] sm:$0x3]  ;;  %v505_v28 = vld [vmem:[%s1284_s5 + $0x18] sm:$0xff] }
  0x2d   : > { %344 = vmatpush1.msra.mxu0 %v281_v40  ;;  %701 = vmatprep.subr.mxu1 %v413_v53  ;;  %v312_v19 = vrot.slane %v307_v17, %v311_v16  ;;  %v316_v20 = vrot.slane %v307_v17, %v315_v18  ;;  %v506_v27 = vld [vmem:[%s1284_s5 + $0x20] sm:$0xff]  ;;  %v504_v29 = vld [vmem:[%s1284_s5 + $0x10] sm:$0xff]  ;;  %v503_v30 = vld [vmem:[%s1284_s5 + $0x8] sm:$0xff] }
  0x2e   : > { %345 = vmatprep.subr.mxu0 %v280_v42  ;;  %702 = vmatpush3.msra.mxu1 %v397_v55  ;;  %v502_v31 = vld [vmem:[%s1284_s5] sm:$0xff] }
  0x2f   : > { %346 = vmatpush1.msra.mxu0 %v279_v44  ;;  %703 = vmatprep.subr.mxu1 %v412_v56  ;;  %v675_v33 = vld [vmem:[%s1283_s4] ss:$0 sm:$0xff] }
  0x30   : > { %347 = vmatprep.subr.mxu0 %v278_v46  ;;  %704 = vmatpush3.msra.mxu1 %v396_v57  ;;  %v676_v38 = vld [vmem:[%s1285_s6] ss:$0 sm:$0xff] }
  0x31   : > { %348 = vmatpush1.msra.mxu0 %v277_v48  ;;  %705 = vmatprep.subr.mxu1 %v411_v58 }
  0x32   : > { %349 = vmatprep.subr.mxu0 %v276_v50  ;;  %706 = vmatpush3.msra.mxu1 %v395_v59 }
  0x33   : > { %350 = vmatpush1.msra.mxu0 %v275_v52  ;;  %707 = vmatprep.subr.mxu1 %v410_v60 }
  0x34   : > { %384 = vmatmul.mubr.f32.vlgmr.msra.gmra.mxu0 %v274_v54  ;;  %733 = vmatprep.subr.mxu0 %v871_v4 }
  0x35   : > { %708 = vmatpush3.msra.mxu1 %v394_v61  ;;  %734 = vmatpush3.msra.mxu0 %v517_v2 }
  0x36   : > { %709 = vmatprep.subr.mxu1 %v409_v62  ;;  %735 = vmatprep.subr.mxu0 %v871_v4 }
  0x37   : > { %710 = vmatpush3.msra.mxu1 %v393_v63  ;;  %736 = vmatpush3.msra.mxu0 %v516_v3 }
  0x38   : > { %711 = vmatprep.subr.mxu1 %v408_v0  ;;  %737 = vmatprep.subr.mxu0 %v871_v4 }
  0x39   : > { %712 = vmatpush3.msra.mxu1 %v392_v1  ;;  %738 = vmatpush3.msra.mxu0 %v515_v5 }
  0x3a   : > { %739 = vmatprep.subr.mxu0 %v871_v4  ;;  %765 = vmatprep.mubr.msk.f32.mxu0 %vm872_vm0, %v871_v4 }
  0x3b   : > { %740 = vmatpush3.msra.mxu0 %v514_v6 }
  0x3c   : > { %741 = vmatprep.subr.mxu0 %v871_v4 }
  0x3d   : > { %742 = vmatpush3.msra.mxu0 %v513_v7 }
  0x3e   : > { %743 = vmatprep.subr.mxu0 %v871_v4 }
  0x3f   : > { %744 = vmatpush3.msra.mxu0 %v512_v8 }
  0x40   : > { %745 = vmatprep.subr.mxu0 %v871_v4 }
  0x41   : > { %746 = vmatpush3.msra.mxu0 %v511_v9 }
  0x42   : > { %747 = vmatprep.subr.mxu0 %v871_v4 }
  0x43   : > { %748 = vmatpush3.msra.mxu0 %v510_v10 }
  0x44   : > { %749 = vmatprep.subr.mxu0 %v871_v4 }
  0x45   : > { %750 = vmatpush3.msra.mxu0 %v509_v11 }
  0x46   : > { %751 = vmatprep.subr.mxu0 %v871_v4 }
  0x47   : > { %752 = vmatpush3.msra.mxu0 %v508_v12 }
  0x48   : > { %753 = vmatprep.subr.mxu0 %v871_v4 }
  0x49   : > { %754 = vmatpush3.msra.mxu0 %v507_v13 }
  0x4a   : > { %755 = vmatprep.subr.mxu0 %v871_v4 }
  0x4b   : > { %756 = vmatpush3.msra.mxu0 %v506_v27 }
  0x4c   : > { %757 = vmatprep.subr.mxu0 %v871_v4 }
  0x4d   : > { %758 = vmatpush3.msra.mxu0 %v505_v28 }
  0x4e   : > { %759 = vmatprep.subr.mxu0 %v871_v4 }
  0x4f   : > { %760 = vmatpush3.msra.mxu0 %v504_v29 }
  0x50   : > { %761 = vmatprep.subr.mxu0 %v871_v4 }
  0x51   : > { %762 = vmatpush3.msra.mxu0 %v503_v30 }
  0x52   : > { %763 = vmatprep.subr.mxu0 %v871_v4 }
  0x53   : > { %764 = vmatpush3.msra.mxu0 %v502_v31 }
  0xf4   : > { %v385_v21 = vpop.f32.mrf.mxu0 }
  0xf5   : > { %v386_v22 = vadd.f32 %v385_v21, %v312_v19 }
  0xf6   : > { %v387_v23 = vpop.f32.mrf.mxu0 }
  0xf7   : > { %v388_v24 = vadd.f32 %v387_v23, %v316_v20  ;;  %v390_v26 = vmax.f32 %v386_v22, 0.0 }
  0xf9   : > { %v391_v25 = vmax.f32 %v388_v24, 0.0 }
  0xfb   : > { %495 = vmatprep.mubr.f32.mxu1 %v391_v25 }
  0xfc   : > { %496 = vmatmul.mubr.f32.vlgmr.msra.gmra.mxu1 %v390_v26 }
 0x1bc   : > { %v713_v32 = vpop.f32.mrf.mxu1 }
 0x1be   : > { %v714_v34 = vpop.f32.mrf.mxu1 }
 0x1bf   : > { %v715_v35 = vadd.f32 %v714_v34, %v713_v32 }
 0x1c1   : > { %v498_v36 = vadd.f32 %v715_v35, %v675_v33 }
 0x1c3   : > { %v501_v37 = vmax.f32 %v498_v36, 0.0 }
 0x1c5   : > { %766 = vmatmul.mubr.f32.vlgmr.msra.gmra.mxu0 %v501_v37 }
 0x285   : > { %v591_v4 = vpop.f32.mrf.mxu0 }
 0x286   : > { %v592_v39 = vadd.f32 %v676_v38, %v591_v4 }
 0x287   : > { %v767_v40 = vpop.f32.mrf.mxu0 }
 0x288   : > { %595 = vst [vmem:[%s269_s21] sm:$0xff] %v592_v39 }
 0x289   : > { %822 = shalt.err (!%p819_p3)
}
 0x28a   : > { %s823_s18 = scalar_lea.hbm %s1244_s29, 128  ;;  %s827_s20 = scalar_lea.hbm %s1286_s7, 256 }
 0x28b   : > { %p824_p4 = scmp.ne.s32.totalorder %s1244_s29, %s823_s18  ;;  %p828_p9 = scmp.lt.s32.totalorder %s1244_s29, %s1286_s7 }
 0x28c   : > { %p829_p10 = scmp.lt.s32.totalorder %s827_s20, %s823_s18 }
 0x28d   : > { %p825_p7 = pnand %p824_p4, %p952_p5 }
 0x28e   : > { %p830_p11 = por %p829_p10, %p828_p9 }
 0x28f   : > { %p826_p8 = pneg %p825_p7 }
 0x291   : > { %p831_p12 = pnand %p830_p11, %p826_p8 }
 0x293   : > { %834 = shalt.err (!%p831_p12)
}
 0x294   : > { %768 = dma.vmem_to_hbm [thread:$0]  (%p952_p5), %s611_s22, 128, %s1244_s29, %s597_s15  }
 0x295 PF: > { %p774_p13 = scmp.ge.s32.totalorder %s869_s27, 2  ;;  %s622_s23 = sand.u32 1, %s857_s24  }
 0x296   : > { %s623_s8 = scalar_lea.sflag [#allocation3], %s622_s23 }
 0x297   : > { %p771_p0 = pnand %p774_p13, %p956_p6 }
 0x299   : > { %p772_p1 = pneg %p771_p0 }
 0x29b   : > { %852 = dma.done.wait (%p772_p1), %s623_s8, 128  }
 0x29c   : > { %854 = vsyncadd (%p772_p1), %s623_s8, 4294967168  ;;  %p17_p2 = scmp.ge.s32.totalorder %s939_s30, 4   ;;  %s1289_s24 = smov %s861_s25 }
 0x29d   : > { %s1290_s25 = smov %s865_s26  ;;  %s1291_s26 = smov %s950_s10 }
 0x29e   : > { %s1292_s27 = smov %s939_s30  ;;  %19 = sbr.rel (!%p17_p2) target bundleno = 3 (0x3), region = 83 }
 0x2a3   :  { %628 = vsyncpa [#allocation3], 1 }
 0x2a4   :  { %630 = vsyncpa [#allocation3 + $0x1], 1 }

</bundles_post_ra>
